<compile_context>
chip_gen: v7x
topology: tpu7x:2x2x1
jax: 0.10.0
libtpu: 0.0.40
codegen_flags: <defaults>
</compile_context>

<pallas_src>
import functools

import jax
import jax.numpy as jnp
from jax import lax
from jax.experimental import pallas as pl
from jax.experimental.pallas import tpu as pltpu

LANES = 128  # TPU lane width; all packed slabs / padded outputs use this.


# ----------------------------- Pallas kernel ------------------------------- #
def _rilinkpred_kernel(adj_ref, x_ref, w_ref, b_ref, adj_pred_ref, z_ref,
                       *, f_in):
    """Fused RI -> GCN -> GCN -> decoder forward on VMEM-resident tiles.

    adj_ref : [N, N]            bf16  GCN-normalized adjacency (symmetric)
    x_ref   : [N, F_IN]         f32   raw node features (cast to bf16 here)
    w_ref   : [F_IN+128, 128]   bf16  rows 0:F_IN     -> rw1 = R @ W1 (cols padded)
                                      rows F_IN:+128  -> W2 (rows & cols padded)
    b_ref   : [16, 128]         f32   row 0 -> b1 (padded), row 8 -> b2 (padded)
    adj_pred_ref : [N, N]             sigmoid(z @ z.T)
    z_ref   : [N, 128]          f32   z zero-padded to 128 lanes (cols >= OUT are 0)
    """
    adj = adj_ref[...]                                    # [N, N]   bf16
    x = x_ref[...].astype(jnp.bfloat16)                   # [N, F_IN] bf16
    rw1 = w_ref[0:f_in, :]                                # [F_IN, 128] bf16
    w2f = w_ref[f_in:f_in + LANES, :]                     # [128, 128]  bf16
    b1 = b_ref[0:1, :]                                    # [1, 128] f32
    b2 = b_ref[8:9, :]                                    # [1, 128] f32

    # GCNConv 1 (RI projection pre-folded into rw1).  bf16 MXU, f32 accum.
    xw1 = jnp.dot(x, rw1, preferred_element_type=jnp.float32)         # [N, 128]
    h = jnp.dot(adj, xw1.astype(jnp.bfloat16),
                preferred_element_type=jnp.float32) + b1
    h = jnp.maximum(h, 0.0)                               # ReLU (f32); pad cols stay 0

    # GCNConv 2.
    hw2 = jnp.dot(h.astype(jnp.bfloat16), w2f,
                  preferred_element_type=jnp.float32)                 # [N, 128]
    z_pad = jnp.dot(adj, hw2.astype(jnp.bfloat16),
                    preferred_element_type=jnp.float32) + b2          # [N, 128]
    z_ref[...] = z_pad                                    # lane-dense full store

    # Decoder.  Padded columns of z_pad are exactly zero, so
    # z_pad @ z_pad.T == z @ z.T; contract dim 1 of both operands -> no
    # transpose / relayout.  Kept in f32 so logits near 0.5 are not shifted.
    logits = lax.dot_general(z_pad, z_pad, (((1,), (1,)), ((), ())),
                             preferred_element_type=jnp.float32)
    adj_pred_ref[...] = jax.nn.sigmoid(logits).astype(adj_pred_ref.dtype)


def _rilinkpred_pallas(adj_bf16, x, w_slab, b_slab, *, adj_dtype=jnp.float32):
    n = adj_bf16.shape[0]
    f_in = x.shape[1]
    kernel = functools.partial(_rilinkpred_kernel, f_in=f_in)
    vmem = pl.BlockSpec(memory_space=pltpu.MemorySpace.VMEM)

    flops = 2 * n * (f_in * LANES          # x @ rw1
                     + n * LANES           # adj @ xw1
                     + LANES * LANES       # h @ w2
                     + n * LANES           # adj @ hw2
                     + n * LANES)          # z @ z.T
    bytes_accessed = (adj_bf16.size * 2 + x.size * 4 + w_slab.size * 2
                      + b_slab.size * 4
                      + n * n * jnp.dtype(adj_dtype).itemsize
                      + n * LANES * 4)

    return pl.pallas_call(
        kernel,
        out_shape=(
            jax.ShapeDtypeStruct((n, n), adj_dtype),        # adj_pred
            jax.ShapeDtypeStruct((n, LANES), jnp.float32),  # z (lane-padded)
        ),
        in_specs=[vmem] * 4,
        out_specs=(vmem, vmem),
        compiler_params=pltpu.CompilerParams(
            vmem_limit_bytes=32 * 1024 * 1024),
        cost_estimate=pl.CostEstimate(
            flops=flops, transcendentals=n * n,
            bytes_accessed=bytes_accessed),
    )(adj_bf16, x, w_slab, b_slab)


# ------------------------- one-time prep (hoisted) -------------------------- #
def build_normalized_adjacency(edge_index, num_nodes):
    """Dense GCN-normalized adjacency: D^{-1/2} (A + A^T + I) D^{-1/2}."""
    src, dst = edge_index[0], edge_index[1]
    a = jnp.zeros((num_nodes, num_nodes), jnp.float32)
    a = a.at[src, dst].set(1.0)
    a = a.at[dst, src].set(1.0)                    # undirected
    a = a + jnp.eye(num_nodes, dtype=jnp.float32)  # self loops
    a = jnp.minimum(a, 1.0)                        # dedupe multi-edges
    deg = a.sum(axis=1)
    d_inv_sqrt = jnp.where(deg > 0, 1.0 / jnp.sqrt(deg), 0.0)
    return a * d_inv_sqrt[:, None] * d_inv_sqrt[None, :]


def prepare_inputs(edge_index, num_nodes, r_ri, w1, b1, w2, b2):
    """One-time prep hoisted off the hot path (edge_index / weights static):
    adjacency build + normalization, RI fold rw1 = R @ W1, bf16 casts, and
    lane-dense parameter packing into two slabs."""
    adj_bf16 = build_normalized_adjacency(edge_index, num_nodes).astype(jnp.bfloat16)

    # Fold the RI projection into the first GCN weight (weight-only algebra).
    # TODO(synk): RILayer's exact definition is not in the provided source; it
    # is modeled as a pure, bias-free random linear projection, which is what
    # makes this fold exact.
    rw1 = jnp.dot(r_ri, w1)                        # [F_IN, HIDDEN]
    f_in, hidden = rw1.shape
    out = w2.shape[1]

    # Weight slab (bf16, lane-dense): rows 0:F_IN = rw1 (cols zero-padded to
    # 128), rows F_IN:F_IN+128 = W2 (rows & cols zero-padded).
    w_slab = jnp.zeros((f_in + LANES, LANES), jnp.float32)
    w_slab = w_slab.at[:f_in, :hidden].set(rw1)
    w_slab = w_slab.at[f_in:f_in + hidden, :out].set(w2)
    w_slab = w_slab.astype(jnp.bfloat16)

    # Bias slab (f32, lane-dense): row 0 = b1, row 8 = b2 (zero-padded lanes).
    b_slab = jnp.zeros((16, LANES), jnp.float32)
    b_slab = b_slab.at[0, :hidden].set(b1.reshape(-1))
    b_slab = b_slab.at[8, :out].set(b2.reshape(-1))

    return adj_bf16, w_slab, b_slab


# ------------------------------- hot path ----------------------------------- #
@functools.partial(jax.jit, static_argnames=("out_channels",))
def rilinkpred_forward(x, adj_bf16, w_slab, b_slab, *, out_channels):
    """Hot path: one fused pallas_call + a tiny slice of the padded z slab."""
    adj_pred, z_pad = _rilinkpred_pallas(adj_bf16, x, w_slab, b_slab)
    return adj_pred, z_pad[:, :out_channels]


# --------------------------- f32 reference (check) -------------------------- #
def rilinkpred_reference(x, adj_norm, r_ri, w1, b1, w2, b2):
    x_ = x @ r_ri
    h = jax.nn.relu(adj_norm @ (x_ @ w1) + b1)
    z = adj_norm @ (h @ w2) + b2
    return jax.nn.sigmoid(z @ z.T), z


def glorot(key, shape):
    fan_in, fan_out = shape
    limit = jnp.sqrt(6.0 / (fan_in + fan_out))
    return jax.random.uniform(key, shape, jnp.float32, -limit, limit)


# --------------------------------- main ------------------------------------- #
if __name__ == "__main__":
    N = 128          # number of nodes
    F_IN = 16        # raw input feature dim
    DIM = 32         # RI-layer output dim (get_numdims)
    HIDDEN = 32      # hidden_channels
    OUT = 16         # out_channels
    NUM_EDGES = 256

    key = jax.random.PRNGKey(0)
    k_x, k_e1, k_e2, k_r, k_w1, k_w2 = jax.random.split(key, 6)

    x = jax.random.normal(k_x, (N, F_IN), jnp.float32)
    edge_index = jnp.stack([
        jax.random.randint(k_e1, (NUM_EDGES,), 0, N),
        jax.random.randint(k_e2, (NUM_EDGES,), 0, N),
    ]).astype(jnp.int32)

    r_ri = jax.random.normal(k_r, (F_IN, DIM), jnp.float32) / jnp.sqrt(F_IN)
    w1 = glorot(k_w1, (DIM, HIDDEN))
    b1 = jnp.zeros((HIDDEN,), jnp.float32)
    w2 = glorot(k_w2, (HIDDEN, OUT))
    b2 = jnp.zeros((OUT,), jnp.float32)

    # One-time prep (hoisted out of the per-call hot path).
    adj_bf16, w_slab, b_slab = prepare_inputs(edge_index, N, r_ri, w1, b1, w2, b2)
    jax.block_until_ready((adj_bf16, w_slab, b_slab))

    adj_pred, z = rilinkpred_forward(x, adj_bf16, w_slab, b_slab, out_channels=OUT)
    jax.block_until_ready((adj_pred, z))

    # Shape / dtype / sanity checks.
    assert adj_pred.shape == (N, N) and z.shape == (N, OUT)
    assert adj_pred.dtype == jnp.float32 and z.dtype == jnp.float32
    assert bool(jnp.all(jnp.isfinite(adj_pred))) and bool(jnp.all(jnp.isfinite(z)))
    assert bool(jnp.all(adj_pred >= 0.0)) and bool(jnp.all(adj_pred <= 1.0))

    # Numerics vs a full-f32 reference.  Loose tolerances: the kernel uses a
    # bf16 adjacency and bf16 MXU operands (f32 accumulation), per the review.
    adj_norm_f32 = build_normalized_adjacency(edge_index, N)
    adj_fp32, z_fp32 = rilinkpred_reference(x, adj_norm_f32, r_ri, w1, b1, w2, b2)
    assert float(jnp.max(jnp.abs(adj_pred - adj_fp32))) < 0.12
    assert float(jnp.max(jnp.abs(z - z_fp32))) < 0.15

    print("KERNEL_OK")
</pallas_src>

<mosaic_0001>
module attributes {stable_mosaic.version = 11 : i64} {
  func.func @_rilinkpred_kernel(%arg0: memref<128x128xbf16, #tpu.memory_space<vmem>>, %arg1: memref<128x16xf32, #tpu.memory_space<vmem>>, %arg2: memref<144x128xbf16, #tpu.memory_space<vmem>>, %arg3: memref<16x128xf32, #tpu.memory_space<vmem>>, %arg4: memref<128x128xf32, #tpu.memory_space<vmem>>, %arg5: memref<128x128xf32, #tpu.memory_space<vmem>>) attributes {dimension_semantics = [], scalar_prefetch = 0 : i64, scratch_operands = 0 : i64, tpu.core_type = #tpu.core_type<tc>} {
    %c0 = arith.constant 0 : index
    %c0_0 = arith.constant 0 : index
    %0 = vector.load %arg0[%c0, %c0_0] : memref<128x128xbf16, #tpu.memory_space<vmem>>, vector<128x128xbf16>
    %c0_1 = arith.constant 0 : index
    %c0_2 = arith.constant 0 : index
    %1 = vector.load %arg1[%c0_1, %c0_2] : memref<128x16xf32, #tpu.memory_space<vmem>>, vector<128x16xf32>
    %2 = arith.truncf %1 : vector<128x16xf32> to vector<128x16xbf16>
    %c0_3 = arith.constant 0 : index
    %c0_4 = arith.constant 0 : index
    %3 = vector.load %arg2[%c0_3, %c0_4] : memref<144x128xbf16, #tpu.memory_space<vmem>>, vector<16x128xbf16>
    %c16 = arith.constant 16 : index
    %c0_5 = arith.constant 0 : index
    %4 = vector.load %arg2[%c16, %c0_5] : memref<144x128xbf16, #tpu.memory_space<vmem>>, vector<128x128xbf16>
    %c0_6 = arith.constant 0 : index
    %c0_7 = arith.constant 0 : index
    %5 = vector.load %arg3[%c0_6, %c0_7] : memref<16x128xf32, #tpu.memory_space<vmem>>, vector<1x128xf32>
    %c8 = arith.constant 8 : index
    %c0_8 = arith.constant 0 : index
    %6 = vector.load %arg3[%c8, %c0_8] : memref<16x128xf32, #tpu.memory_space<vmem>>, vector<1x128xf32>
    %cst = arith.constant dense<0.000000e+00> : vector<128x128xf32>
    %7 = tpu.matmul %2, %3, %cst {dimension_numbers = #tpu.dot_dimension_numbers<[1], [0], [0], [1], [0, 0, 1, 1], [], []>} : vector<128x16xbf16>, vector<16x128xbf16>, vector<128x128xf32> -> vector<128x128xf32>
    %8 = arith.truncf %7 : vector<128x128xf32> to vector<128x128xbf16>
    %cst_9 = arith.constant dense<0.000000e+00> : vector<128x128xf32>
    %9 = tpu.matmul %0, %8, %cst_9 {dimension_numbers = #tpu.dot_dimension_numbers<[1], [0], [0], [1], [0, 0, 1, 1], [], []>} : vector<128x128xbf16>, vector<128x128xbf16>, vector<128x128xf32> -> vector<128x128xf32>
    %10 = vector.broadcast %5 : vector<1x128xf32> to vector<128x128xf32>
    %11 = arith.addf %9, %10 : vector<128x128xf32>
    %cst_10 = arith.constant 0.000000e+00 : f32
    %12 = vector.broadcast %cst_10 : f32 to vector<128x128xf32>
    %13 = arith.maximumf %11, %12 : vector<128x128xf32>
    %14 = arith.truncf %13 : vector<128x128xf32> to vector<128x128xbf16>
    %cst_11 = arith.constant dense<0.000000e+00> : vector<128x128xf32>
    %15 = tpu.matmul %14, %4, %cst_11 {dimension_numbers = #tpu.dot_dimension_numbers<[1], [0], [0], [1], [0, 0, 1, 1], [], []>} : vector<128x128xbf16>, vector<128x128xbf16>, vector<128x128xf32> -> vector<128x128xf32>
    %16 = arith.truncf %15 : vector<128x128xf32> to vector<128x128xbf16>
    %cst_12 = arith.constant dense<0.000000e+00> : vector<128x128xf32>
    %17 = tpu.matmul %0, %16, %cst_12 {dimension_numbers = #tpu.dot_dimension_numbers<[1], [0], [0], [1], [0, 0, 1, 1], [], []>} : vector<128x128xbf16>, vector<128x128xbf16>, vector<128x128xf32> -> vector<128x128xf32>
    %18 = vector.broadcast %6 : vector<1x128xf32> to vector<128x128xf32>
    %19 = arith.addf %17, %18 : vector<128x128xf32>
    %c0_13 = arith.constant 0 : index
    %c0_14 = arith.constant 0 : index
    %20 = vector.load %arg5[%c0_13, %c0_14] : memref<128x128xf32, #tpu.memory_space<vmem>>, vector<128x128xf32>
    tpu.vector_store %arg5[%c0_13, %c0_14], %19 {strides = array<i32>} : memref<128x128xf32, #tpu.memory_space<vmem>>, vector<128x128xf32>,
    %cst_15 = arith.constant dense<0.000000e+00> : vector<128x128xf32>
    %21 = tpu.matmul %19, %19, %cst_15 {dimension_numbers = #tpu.dot_dimension_numbers<[1], [1], [0], [0], [0, 0, 1, 0], [], []>} : vector<128x128xf32>, vector<128x128xf32>, vector<128x128xf32> -> vector<128x128xf32>
    %22 = arith.negf %21 : vector<128x128xf32>
    %23 = math.exp %22 : vector<128x128xf32>
    %cst_16 = arith.constant 1.000000e+00 : f32
    %24 = vector.broadcast %cst_16 : f32 to vector<128x128xf32>
    %25 = arith.addf %24, %23 : vector<128x128xf32>
    %26 = arith.divf %24, %25 : vector<128x128xf32>
    %c0_17 = arith.constant 0 : index
    %c0_18 = arith.constant 0 : index
    %27 = vector.load %arg4[%c0_17, %c0_18] : memref<128x128xf32, #tpu.memory_space<vmem>>, vector<128x128xf32>
    tpu.vector_store %arg4[%c0_17, %c0_18], %26 {strides = array<i32>} : memref<128x128xf32, #tpu.memory_space<vmem>>, vector<128x128xf32>,
    return
  }
}

</mosaic_0001>

<bundles_post_ra>
// kernel: rilinkpred_forward.1
= control target key start
LH: loop header
LB: loop body
LE: loop exit
PB: predicated region body
PF: predicated region fallthrough
CT: control target
= control target key end

     0   :  { %vm87_vm0 = vcmask 130048   ;;  %s1632_s0 = inlined_call_operand.vmem [shape: bf16[128,128], index: 0, kind: input, shape index: {}]   ;;  %s1633_s1 = inlined_call_operand.vmem [shape: f32[128,16], index: 1, kind: input, shape index: {}]   ;;  %s1634_s2 = inlined_call_operand.vmem [shape: bf16[144,128], index: 2, kind: input, shape index: {}]   ;;  %s1635_s3 = inlined_call_operand.vmem [shape: f32[16,128], index: 3, kind: input, shape index: {}]   ;;  %s1636_s4 = inlined_call_operand.hbm [shape: f32[128,128], index: 4, kind: output, shape index: {0}]   ;;  %s1637_s5 = inlined_call_operand.vmem [shape: f32[128,128], index: 5, kind: output, shape index: {1}]  }
   0x1   :  { %v1274_v0 = vld [vmem:[%s1634_s2] sm:$0xff]   ;;  %v38_v2 = vld [vmem:[%s1633_s1 + $0x8] sm:$0xff]  ;;  %v39_v3 = vld [vmem:[%s1633_s1 + $0x10] sm:$0xff] }
   0x2   :  { %v37_v1 = vld [vmem:[%s1633_s1] sm:$0xff]  ;;  %1069 = vmatprep.subr.bf16.mxu1 %v1274_v0  ;;  %v40_v5 = vld [vmem:[%s1633_s1 + $0x18] sm:$0xff]  ;;  %v42_v7 = vld [vmem:[%s1633_s1 + $0x28] sm:$0xff] }
   0x3   :  { %v53_v4 = vpack.c.bf16 %v38_v2, %v37_v1  ;;  %v41_v6 = vld [vmem:[%s1633_s1 + $0x20] sm:$0xff]  ;;  %1070 = vmatpush3.bf16.msra.mxu1 %v1274_v0  ;;  %v54_v8 = vpack.c.bf16 %v40_v5, %v39_v3  ;;  %v43_v10 = vld [vmem:[%s1633_s1 + $0x30] sm:$0xff]  ;;  %v44_v11 = vld [vmem:[%s1633_s1 + $0x38] sm:$0xff] }
   0x4   :  { %v55_v9 = vpack.c.bf16 %v42_v7, %v41_v6  ;;  %v45_v12 = vld [vmem:[%s1633_s1 + $0x40] sm:$0xff]  ;;  %v46_v13 = vld [vmem:[%s1633_s1 + $0x48] sm:$0xff]  ;;  %v56_v14 = vpack.c.bf16 %v44_v11, %v43_v10  ;;  %v47_v16 = vld [vmem:[%s1633_s1 + $0x50] sm:$0xff] }
   0x5   :  { %1071 = vmatprep.mubr.msk.bf16.mxu1 %vm87_vm0, %v53_v4  ;;  %v57_v15 = vpack.c.bf16 %v46_v13, %v45_v12  ;;  %v48_v17 = vld [vmem:[%s1633_s1 + $0x58] sm:$0xff]  ;;  %v49_v18 = vld [vmem:[%s1633_s1 + $0x60] sm:$0xff]  ;;  %v50_v19 = vld [vmem:[%s1633_s1 + $0x68] sm:$0xff] }
   0x6   :  { %1072 = vmatmul.mubr.msk.bf16.vlgmr.msra.gmra.mrb[0].mxu1 %vm87_vm0, %v54_v8 }
   0x7   :  { %1075 = vmatprep.mubr.msk.bf16.mxu1 %vm87_vm0, %v55_v9 }
   0xe   :  { %1076 = vmatmul.mubr.msk.bf16.gmra.mrb[4].mxu1 %vm87_vm0, %v56_v14 }
   0xf   :  { %1079 = vmatprep.mubr.msk.bf16.mxu1 %vm87_vm0, %v57_v15 }
  0x10   :  { %11 = vsyncpa [#allocation3], 0  ;;  %v58_v20 = vpack.c.bf16 %v48_v17, %v47_v16  ;;  %v59_v21 = vpack.c.bf16 %v50_v19, %v49_v18  ;;  %v51_v22 = vld [vmem:[%s1633_s1 + $0x70] sm:$0xff]  ;;  %v52_v23 = vld [vmem:[%s1633_s1 + $0x78] sm:$0xff] }
  0x11   :  { %v60_v24 = vpack.c.bf16 %v52_v23, %v51_v22  ;;  %v1474_v25 = vld [vmem:[%s1632_s0] sm:$0xff]   ;;  %v1283_v26 = vld [vmem:[%s1634_s2 + $0x8] sm:$0xff]   ;;  %v1284_v27 = vld [vmem:[%s1634_s2 + $0x10] sm:$0xff]  }
  0x12   :  { %1119 = vmatprep.subr.bf16.mxu0 %v1283_v26  ;;  %v1285_v28 = vld [vmem:[%s1634_s2 + $0x18] sm:$0xff]   ;;  %v1286_v29 = vld [vmem:[%s1634_s2 + $0x20] sm:$0xff]   ;;  %v1287_v30 = vld [vmem:[%s1634_s2 + $0x28] sm:$0xff]  }
  0x13   :  { %1120 = vmatpush3.bf16.msra.mxu0 %v1283_v26  ;;  %v1288_v31 = vld [vmem:[%s1634_s2 + $0x30] sm:$0xff]   ;;  %v1498_v56 = vld [vmem:[%s1632_s0 + $0x8] sm:$0xff]   ;;  %v1510_v58 = vld [vmem:[%s1632_s0 + $0x18] sm:$0xff]  }
  0x14   :  { %1121 = vmatprep.subr.bf16.mxu0 %v1284_v27  ;;  %v1503_v57 = vld [vmem:[%s1632_s0 + $0x10] sm:$0xff]   ;;  %v1515_v59 = vld [vmem:[%s1632_s0 + $0x20] sm:$0xff]   ;;  %v1522_v60 = vld [vmem:[%s1632_s0 + $0x28] sm:$0xff]  }
  0x15   :  { %v1527_v61 = vld [vmem:[%s1632_s0 + $0x30] sm:$0xff]   ;;  %v1534_v62 = vld [vmem:[%s1632_s0 + $0x38] sm:$0xff]   ;;  %v1290_v0 = vld [vmem:[%s1634_s2 + $0x40] sm:$0xff]  }
  0x16   :  { %1080 = vmatmul.mubr.msk.bf16.gmra.mrb[8].mxu1 %vm87_vm0, %v58_v20  ;;  %v1289_v63 = vld [vmem:[%s1634_s2 + $0x38] sm:$0xff]   ;;  %v946_v1 = vld [vmem:[%s1635_s3] ss:$0 sm:$0xff] }
  0x17   :  { %1083 = vmatprep.mubr.msk.bf16.mxu1 %vm87_vm0, %v59_v21  ;;  %1122 = vmatpush3.bf16.msra.mxu0 %v1284_v27 }
  0x18   :  { %1123 = vmatprep.subr.bf16.mxu0 %v1285_v28 }
  0x1b   :  { %1124 = vmatpush3.bf16.msra.mxu0 %v1285_v28 }
  0x1c   :  { %1125 = vmatprep.subr.bf16.mxu0 %v1286_v29 }
  0x1e   :  { %1084 = vmatmul.mubr.msk.bf16.gmra.mrb[12].mxu1 %vm87_vm0, %v60_v24 }
  0x1f   :  { %1103 = vmatprep.mubr.bf16.mxu1 %v1474_v25  ;;  %1126 = vmatpush3.bf16.msra.mxu0 %v1286_v29 }
  0x20   :  { %1127 = vmatprep.subr.bf16.mxu0 %v1287_v30 }
  0x23   :  { %1128 = vmatpush3.bf16.msra.mxu0 %v1287_v30 }
  0x24   :  { %1129 = vmatprep.subr.bf16.mxu0 %v1288_v31 }
  0x27   :  { %1130 = vmatpush3.bf16.msra.mxu0 %v1288_v31 }
  0x28   :  { %1131 = vmatprep.subr.bf16.mxu0 %v1289_v63 }
  0x2b   :  { %1132 = vmatpush3.bf16.msra.mxu0 %v1289_v63 }
  0x2c   :  { %1133 = vmatprep.subr.bf16.mxu0 %v1290_v0 }
  0x2f   :  { %1134 = vmatpush3.bf16.msra.mxu0 %v1290_v0 }
  0xd9   :  { %v1073_v32 = vpop.f32.mrb[0].mxu1 }
  0xda   :  { %v146_v33 = vpop.f32.mrb[1].mxu1 }
  0xdb   :  { %v1074_v34 = vpop.f32.mrb[2].mxu1 }
  0xdc   :  { %v210_v35 = vpack.c.bf16 %v1074_v34, %v1073_v32  ;;  %v149_v36 = vpop.f32.mrb[3].mxu1 }
  0xdd   :  { %v209_v37 = vpack.c.bf16 %v149_v36, %v146_v33 }
  0xdf   :  { %1087 = vmatprep.subr.bf16.mxu1 %v209_v37 }
  0xe0   :  { %1088 = vmatpush3.bf16.msra.mxu1 %v209_v37 }
  0xe1   :  { %v1077_v38 = vpop.f32.mrb[4].mxu1  ;;  %1089 = vmatprep.subr.bf16.mxu1 %v210_v35 }
  0xe2   :  { %v162_v39 = vpop.f32.mrb[5].mxu1 }
  0xe3   :  { %v1078_v40 = vpop.f32.mrb[6].mxu1 }
  0xe4   :  { %v212_v41 = vpack.c.bf16 %v1078_v40, %v1077_v38  ;;  %v165_v42 = vpop.f32.mrb[7].mxu1  ;;  %1090 = vmatpush3.bf16.msra.mxu1 %v210_v35 }
  0xe5   :  { %v211_v43 = vpack.c.bf16 %v165_v42, %v162_v39 }
  0xe7   :  { %1091 = vmatprep.subr.bf16.mxu1 %v211_v43 }
  0xe8   :  { %1092 = vmatpush3.bf16.msra.mxu1 %v211_v43 }
  0xe9   :  { %v1081_v44 = vpop.f32.mrb[8].mxu1  ;;  %1093 = vmatprep.subr.bf16.mxu1 %v212_v41 }
  0xea   :  { %v178_v45 = vpop.f32.mrb[9].mxu1 }
  0xeb   :  { %v1082_v46 = vpop.f32.mrb[10].mxu1 }
  0xec   :  { %v214_v47 = vpack.c.bf16 %v1082_v46, %v1081_v44  ;;  %v181_v48 = vpop.f32.mrb[11].mxu1  ;;  %1094 = vmatpush3.bf16.msra.mxu1 %v212_v41 }
  0xed   :  { %v213_v49 = vpack.c.bf16 %v181_v48, %v178_v45 }
  0xef   :  { %1095 = vmatprep.subr.bf16.mxu1 %v213_v49 }
  0xf0   :  { %1096 = vmatpush3.bf16.msra.mxu1 %v213_v49 }
  0xf1   :  { %v1085_v50 = vpop.f32.mrb[12].mxu1  ;;  %1097 = vmatprep.subr.bf16.mxu1 %v214_v47 }
  0xf2   :  { %v194_v51 = vpop.f32.mrb[13].mxu1 }
  0xf3   :  { %v1086_v52 = vpop.f32.mrb[14].mxu1 }
  0xf4   :  { %v216_v53 = vpack.c.bf16 %v1086_v52, %v1085_v50  ;;  %v197_v54 = vpop.f32.mrb[15].mxu1  ;;  %1098 = vmatpush3.bf16.msra.mxu1 %v214_v47 }
  0xf5   :  { %v215_v55 = vpack.c.bf16 %v197_v54, %v194_v51 }
  0xf7   :  { %1099 = vmatprep.subr.bf16.mxu1 %v215_v55 }
  0xf8   :  { %1100 = vmatpush3.bf16.msra.mxu1 %v215_v55 }
  0xf9   :  { %1101 = vmatprep.subr.bf16.mxu1 %v216_v53 }
  0xfc   :  { %1102 = vmatpush3.bf16.msra.mxu1 %v216_v53 }
  0xff   :  { %1104 = vmatmul.mubr.bf16.vlgmr.msra.gmra.mrb[16].mxu1 %v1498_v56 }
 0x100   :  { %1107 = vmatprep.mubr.bf16.mxu1 %v1503_v57 }
 0x107   :  { %1108 = vmatmul.mubr.bf16.gmra.mrb[20].mxu1 %v1510_v58 }
 0x108   :  { %1111 = vmatprep.mubr.bf16.mxu1 %v1515_v59 }
 0x10f   :  { %1112 = vmatmul.mubr.bf16.gmra.mrb[24].mxu1 %v1522_v60 }
 0x110   :  { %1115 = vmatprep.mubr.bf16.mxu1 %v1527_v61 }
 0x117   :  { %1116 = vmatmul.mubr.bf16.gmra.mrb[28].mxu1 %v1534_v62 }
 0x118   :  { %1167 = vmatprep.mubr.bf16.mxu1 %v1474_v25 }
 0x1d2   :  { %v1105_v2 = vpop.f32.mrb[16].mxu1 }
 0x1d3   :  { %v312_v3 = vadd.f32 %v1105_v2, %v946_v1  ;;  %v303_v4 = vpop.f32.mrb[17].mxu1 }
 0x1d4   :  { %v304_v5 = vadd.f32 %v946_v1, %v303_v4  ;;  %v1106_v6 = vpop.f32.mrb[18].mxu1 }
 0x1d5   :  { %v315_v7 = vadd.f32 %v1106_v6, %v946_v1  ;;  %v306_v8 = vpop.f32.mrb[19].mxu1  ;;  %v368_v10 = vmax.f32 %v312_v3, 0.0 }
 0x1d6   :  { %v307_v9 = vadd.f32 %v946_v1, %v306_v8  ;;  %v366_v12 = vmax.f32 %v304_v5, 0.0 }
 0x1d7   :  { %v369_v11 = vmax.f32 %v315_v7, 0.0 }
 0x1d8   :  { %v367_v13 = vmax.f32 %v307_v9, 0.0 }
 0x1d9   :  { %v383_v14 = vpack.c.bf16 %v369_v11, %v368_v10 }
 0x1da   :  { %v1109_v15 = vpop.f32.mrb[20].mxu1  ;;  %v382_v16 = vpack.c.bf16 %v367_v13, %v366_v12 }
 0x1db   :  { %v328_v17 = vadd.f32 %v1109_v15, %v946_v1  ;;  %v319_v18 = vpop.f32.mrb[21].mxu1 }
 0x1dc   :  { %v320_v19 = vadd.f32 %v946_v1, %v319_v18  ;;  %v1110_v20 = vpop.f32.mrb[22].mxu1  ;;  %1135 = vmatprep.mubr.bf16.mxu0 %v382_v16 }
 0x1dd   :  { %v331_v21 = vadd.f32 %v1110_v20, %v946_v1  ;;  %v322_v22 = vpop.f32.mrb[23].mxu1  ;;  %1136 = vmatmul.mubr.bf16.vlgmr.msra.gmra.mrb[0].mxu0 %v383_v14  ;;  %v372_v24 = vmax.f32 %v328_v17, 0.0 }
 0x1de   :  { %v323_v23 = vadd.f32 %v946_v1, %v322_v22  ;;  %v370_v26 = vmax.f32 %v320_v19, 0.0 }
 0x1df   :  { %v373_v25 = vmax.f32 %v331_v21, 0.0 }
 0x1e0   :  { %v371_v27 = vmax.f32 %v323_v23, 0.0 }
 0x1e1   :  { %v385_v28 = vpack.c.bf16 %v373_v25, %v372_v24  ;;  %v963_v25 = vld [vmem:[%s1635_s3 + $0x8] ss:$0 sm:$0xff] }
 0x1e2   :  { %v384_v29 = vpack.c.bf16 %v371_v27, %v370_v26  ;;  %v1113_v30 = vpop.f32.mrb[24].mxu1 }
 0x1e3   :  { %v344_v31 = vadd.f32 %v1113_v30, %v946_v1  ;;  %v335_v32 = vpop.f32.mrb[25].mxu1 }
 0x1e4   :  { %v336_v33 = vadd.f32 %v946_v1, %v335_v32  ;;  %v1114_v34 = vpop.f32.mrb[26].mxu1  ;;  %1139 = vmatprep.mubr.bf16.mxu0 %v384_v29 }
 0x1e5   :  { %v347_v35 = vadd.f32 %v1114_v34, %v946_v1  ;;  %v338_v36 = vpop.f32.mrb[27].mxu1  ;;  %1140 = vmatmul.mubr.bf16.gmra.mrb[4].mxu0 %v385_v28  ;;  %v376_v38 = vmax.f32 %v344_v31, 0.0 }
 0x1e6   :  { %v339_v37 = vadd.f32 %v946_v1, %v338_v36  ;;  %v374_v40 = vmax.f32 %v336_v33, 0.0 }
 0x1e7   :  { %v377_v39 = vmax.f32 %v347_v35, 0.0 }
 0x1e8   :  { %v375_v41 = vmax.f32 %v339_v37, 0.0 }
 0x1e9   :  { %v387_v42 = vpack.c.bf16 %v377_v39, %v376_v38 }
 0x1ea   :  { %v386_v43 = vpack.c.bf16 %v375_v41, %v374_v40  ;;  %v1117_v44 = vpop.f32.mrb[28].mxu1 }
 0x1eb   :  { %v360_v45 = vadd.f32 %v1117_v44, %v946_v1  ;;  %v351_v46 = vpop.f32.mrb[29].mxu1 }
 0x1ec   :  { %v352_v47 = vadd.f32 %v946_v1, %v351_v46  ;;  %v1118_v48 = vpop.f32.mrb[30].mxu1  ;;  %1143 = vmatprep.mubr.bf16.mxu0 %v386_v43 }
 0x1ed   :  { %v363_v49 = vadd.f32 %v1118_v48, %v946_v1  ;;  %v354_v50 = vpop.f32.mrb[31].mxu1  ;;  %1144 = vmatmul.mubr.bf16.gmra.mrb[8].mxu0 %v387_v42  ;;  %v380_v52 = vmax.f32 %v360_v45, 0.0 }
 0x1ee   :  { %v355_v51 = vadd.f32 %v946_v1, %v354_v50  ;;  %v378_v54 = vmax.f32 %v352_v47, 0.0 }
 0x1ef   :  { %v381_v53 = vmax.f32 %v363_v49, 0.0 }
 0x1f0   :  { %v379_v55 = vmax.f32 %v355_v51, 0.0 }
 0x1f1   :  { %v389_v63 = vpack.c.bf16 %v381_v53, %v380_v52 }
 0x1f2   :  { %v388_v0 = vpack.c.bf16 %v379_v55, %v378_v54 }
 0x1f4   :  { %1147 = vmatprep.mubr.bf16.mxu0 %v388_v0 }
 0x1f5   :  { %1148 = vmatmul.mubr.bf16.gmra.mrb[12].mxu0 %v389_v63 }
 0x2b0   :  { %v1137_v2 = vpop.f32.mrb[0].mxu0 }
 0x2b1   :  { %v472_v3 = vpop.f32.mrb[1].mxu0 }
 0x2b2   :  { %v1138_v4 = vpop.f32.mrb[2].mxu0 }
 0x2b3   :  { %v536_v5 = vpack.c.bf16 %v1138_v4, %v1137_v2  ;;  %v475_v6 = vpop.f32.mrb[3].mxu0 }
 0x2b4   :  { %v535_v7 = vpack.c.bf16 %v475_v6, %v472_v3 }
 0x2b6   :  { %1151 = vmatprep.subr.bf16.mxu1 %v535_v7 }
 0x2b7   :  { %1152 = vmatpush3.bf16.msra.mxu1 %v535_v7 }
 0x2b8   :  { %v1141_v8 = vpop.f32.mrb[4].mxu0  ;;  %1153 = vmatprep.subr.bf16.mxu1 %v536_v5 }
 0x2b9   :  { %v488_v9 = vpop.f32.mrb[5].mxu0 }
 0x2ba   :  { %v1142_v1 = vpop.f32.mrb[6].mxu0 }
 0x2bb   :  { %v538_v10 = vpack.c.bf16 %v1142_v1, %v1141_v8  ;;  %v491_v11 = vpop.f32.mrb[7].mxu0  ;;  %1154 = vmatpush3.bf16.msra.mxu1 %v536_v5 }
 0x2bc   :  { %v537_v12 = vpack.c.bf16 %v491_v11, %v488_v9 }
 0x2be   :  { %1155 = vmatprep.subr.bf16.mxu1 %v537_v12 }
 0x2bf   :  { %1156 = vmatpush3.bf16.msra.mxu1 %v537_v12 }
 0x2c0   :  { %v1145_v13 = vpop.f32.mrb[8].mxu0  ;;  %1157 = vmatprep.subr.bf16.mxu1 %v538_v10 }
 0x2c1   :  { %v504_v14 = vpop.f32.mrb[9].mxu0 }
 0x2c2   :  { %v1146_v15 = vpop.f32.mrb[10].mxu0 }
 0x2c3   :  { %v540_v16 = vpack.c.bf16 %v1146_v15, %v1145_v13  ;;  %v507_v17 = vpop.f32.mrb[11].mxu0  ;;  %1158 = vmatpush3.bf16.msra.mxu1 %v538_v10 }
 0x2c4   :  { %v539_v18 = vpack.c.bf16 %v507_v17, %v504_v14 }
 0x2c6   :  { %1159 = vmatprep.subr.bf16.mxu1 %v539_v18 }
 0x2c7   :  { %1160 = vmatpush3.bf16.msra.mxu1 %v539_v18 }
 0x2c8   :  { %v1149_v19 = vpop.f32.mrb[12].mxu0  ;;  %1161 = vmatprep.subr.bf16.mxu1 %v540_v16 }
 0x2c9   :  { %v520_v20 = vpop.f32.mrb[13].mxu0 }
 0x2ca   :  { %v1150_v21 = vpop.f32.mrb[14].mxu0 }
 0x2cb   :  { %v542_v22 = vpack.c.bf16 %v1150_v21, %v1149_v19  ;;  %v523_v23 = vpop.f32.mrb[15].mxu0  ;;  %1162 = vmatpush3.bf16.msra.mxu1 %v540_v16 }
 0x2cc   :  { %v541_v24 = vpack.c.bf16 %v523_v23, %v520_v20 }
 0x2ce   :  { %1163 = vmatprep.subr.bf16.mxu1 %v541_v24 }
 0x2cf   :  { %1164 = vmatpush3.bf16.msra.mxu1 %v541_v24 }
 0x2d0   :  { %1165 = vmatprep.subr.bf16.mxu1 %v542_v22 }
 0x2d3   :  { %1166 = vmatpush3.bf16.msra.mxu1 %v542_v22 }
 0x2d6   :  { %1168 = vmatmul.mubr.bf16.vlgmr.msra.gmra.mrb[32].mxu1 %v1498_v56 }
 0x2d7   :  { %1171 = vmatprep.mubr.bf16.mxu1 %v1503_v57 }
 0x2de   :  { %1172 = vmatmul.mubr.bf16.gmra.mrb[36].mxu1 %v1510_v58 }
 0x2df   :  { %1175 = vmatprep.mubr.bf16.mxu1 %v1515_v59 }
 0x2e6   :  { %1176 = vmatmul.mubr.bf16.gmra.mrb[40].mxu1 %v1522_v60 }
 0x2e7   :  { %1179 = vmatprep.mubr.bf16.mxu1 %v1527_v61 }
 0x2ee   :  { %1180 = vmatmul.mubr.bf16.gmra.mrb[44].mxu1 %v1534_v62 }
 0x3a9   :  { %v1169_v26 = vpop.f32.mrb[32].mxu1 }
 0x3aa   :  { %v1557_v27 = vadd.f32 %v1169_v26, %v963_v25  ;;  %v581_v56 = vpop.f32.mrb[33].mxu1 }
 0x3ab   :  { %v582_v28 = vadd.f32 %v963_v25, %v581_v56  ;;  %v1170_v57 = vpop.f32.mrb[34].mxu1 }
 0x3ac   :  { %646 = vst [vmem:[%s1637_s5 + $0x10] sm:$0xff] %v1557_v27  ;;  %v1563_v58 = vadd.f32 %v1170_v57, %v963_v25  ;;  %v584_v59 = vpop.f32.mrb[35].mxu1 }
 0x3ad   :  { %644 = vst [vmem:[%s1637_s5] sm:$0xff] %v582_v28  ;;  %v1568_v60 = vadd.f32 %v963_v25, %v584_v59  ;;  %1215 = vmatprep.mubr.f32.mxu0 %v582_v28 }
 0x3ae   :  { %647 = vst [vmem:[%s1637_s5 + $0x18] sm:$0xff] %v1563_v58  ;;  %v1243_v62 = vpack.c.bf16 %v1563_v58, %v1557_v27 }
 0x3af   :  { %645 = vst [vmem:[%s1637_s5 + $0x8] sm:$0xff] %v1568_v60  ;;  %v1239_v61 = vpack.c.bf16 %v1568_v60, %v582_v28 }
 0x3b1   :  { %1240 = vmatprep.subr.bf16.mxu0 %v1239_v61  ;;  %v1173_v29 = vpop.f32.mrb[36].mxu1 }
 0x3b2   :  { %1242 = vmatpush3.bf16.xpose.msra.mxu0 %v1239_v61  ;;  %v606_v30 = vadd.f32 %v1173_v29, %v963_v25  ;;  %v597_v31 = vpop.f32.mrb[37].mxu1 }
 0x3b3   :  { %1244 = vmatprep.subr.bf16.mxu0 %v1243_v62  ;;  %v598_v32 = vadd.f32 %v963_v25, %v597_v31  ;;  %v1174_v33 = vpop.f32.mrb[38].mxu1 }
 0x3b4   :  { %650 = vst [vmem:[%s1637_s5 + $0x30] sm:$0xff] %v606_v30  ;;  %v609_v34 = vadd.f32 %v1174_v33, %v963_v25  ;;  %v600_v35 = vpop.f32.mrb[39].mxu1 }
 0x3b5   :  { %648 = vst [vmem:[%s1637_s5 + $0x20] sm:$0xff] %v598_v32  ;;  %v601_v36 = vadd.f32 %v963_v25, %v600_v35 }
 0x3b6   :  { %651 = vst [vmem:[%s1637_s5 + $0x38] sm:$0xff] %v609_v34  ;;  %v1251_v46 = vpack.c.bf16 %v609_v34, %v606_v30 }
 0x3b7   :  { %649 = vst [vmem:[%s1637_s5 + $0x28] sm:$0xff] %v601_v36  ;;  %v1247_v37 = vpack.c.bf16 %v601_v36, %v598_v32 }
 0x3b9   :  { %v1177_v38 = vpop.f32.mrb[40].mxu1 }
 0x3ba   :  { %1246 = vmatpush3.bf16.xpose.msra.mxu0 %v1243_v62  ;;  %v622_v39 = vadd.f32 %v1177_v38, %v963_v25  ;;  %v613_v40 = vpop.f32.mrb[41].mxu1 }
 0x3bb   :  { %1248 = vmatprep.subr.bf16.mxu0 %v1247_v37  ;;  %v614_v41 = vadd.f32 %v963_v25, %v613_v40  ;;  %v1178_v42 = vpop.f32.mrb[42].mxu1 }
 0x3bc   :  { %654 = vst [vmem:[%s1637_s5 + $0x50] sm:$0xff] %v622_v39  ;;  %v625_v43 = vadd.f32 %v1178_v42, %v963_v25  ;;  %v616_v44 = vpop.f32.mrb[43].mxu1 }
 0x3bd   :  { %652 = vst [vmem:[%s1637_s5 + $0x40] sm:$0xff] %v614_v41  ;;  %v617_v45 = vadd.f32 %v963_v25, %v616_v44 }
 0x3be   :  { %655 = vst [vmem:[%s1637_s5 + $0x58] sm:$0xff] %v625_v43  ;;  %v1259_v63 = vpack.c.bf16 %v625_v43, %v622_v39 }
 0x3bf   :  { %653 = vst [vmem:[%s1637_s5 + $0x48] sm:$0xff] %v617_v45  ;;  %v1255_v55 = vpack.c.bf16 %v617_v45, %v614_v41 }
 0x3c1   :  { %v1181_v47 = vpop.f32.mrb[44].mxu1 }
 0x3c2   :  { %1250 = vmatpush3.bf16.xpose.msra.mxu0 %v1247_v37  ;;  %v638_v48 = vadd.f32 %v1181_v47, %v963_v25  ;;  %v629_v49 = vpop.f32.mrb[45].mxu1 }
 0x3c3   :  { %1252 = vmatprep.subr.bf16.mxu0 %v1251_v46  ;;  %v630_v50 = vadd.f32 %v963_v25, %v629_v49  ;;  %v1182_v51 = vpop.f32.mrb[46].mxu1 }
 0x3c4   :  { %658 = vst [vmem:[%s1637_s5 + $0x70] sm:$0xff] %v638_v48  ;;  %v641_v52 = vadd.f32 %v1182_v51, %v963_v25  ;;  %v632_v53 = vpop.f32.mrb[47].mxu1 }
 0x3c5   :  { %656 = vst [vmem:[%s1637_s5 + $0x60] sm:$0xff] %v630_v50  ;;  %v633_v54 = vadd.f32 %v963_v25, %v632_v53 }
 0x3c6   :  { %659 = vst [vmem:[%s1637_s5 + $0x78] sm:$0xff] %v641_v52  ;;  %v1267_v2 = vpack.c.bf16 %v641_v52, %v638_v48 }
 0x3c7   :  { %657 = vst [vmem:[%s1637_s5 + $0x68] sm:$0xff] %v633_v54  ;;  %v1263_v0 = vpack.c.bf16 %v633_v54, %v630_v50  ;;  %s1379_s5 = smov [#allocation2]  }
 0x3c8   :  { %s922_s12 = sshll.u32 %s1379_s5, 4  ;;  %s923_s12 = int_to_ptr.vmem [resolvable:$true] %s922_s12 }
 0x3c9   :  { %s1355_s3 = scalar_lea.vmem %s923_s12, 2048  ;;  %p1360_p1 = scmp.lt.s32.totalorder %s923_s12, %s923_s12 }
 0x3ca   :  { %1254 = vmatpush3.bf16.xpose.msra.mxu0 %v1251_v46  ;;  %p1356_p0 = scmp.ne.s32.totalorder %s923_s12, %s1355_s3  ;;  %p1361_p2 = scmp.lt.s32.totalorder %s1355_s3, %s1355_s3 }
 0x3cb   :  { %1256 = vmatprep.subr.bf16.mxu0 %v1255_v55 }
 0x3cc   :  { %p1362_p3 = por %p1361_p2, %p1360_p1 }
 0x3ce   :  { %p1363_p4 = pnand %p1362_p3, %p1356_p0 }
 0x3d2   :  { %1258 = vmatpush3.bf16.xpose.msra.mxu0 %v1255_v55 }
 0x3d3   :  { %1260 = vmatprep.subr.bf16.mxu0 %v1259_v63 }
 0x3da   :  { %1262 = vmatpush3.bf16.xpose.msra.mxu0 %v1259_v63 }
 0x3db   :  { %1264 = vmatprep.subr.bf16.mxu0 %v1263_v0 }
 0x3e2   :  { %1266 = vmatpush3.bf16.xpose.msra.mxu0 %v1263_v0 }
 0x3e3   :  { %1268 = vmatprep.subr.bf16.mxu0 %v1267_v2 }
 0x3ea   :  { %1270 = vmatpush3.bf16.xpose.msra.mxu0 %v1267_v2 }
 0x3f1   :  { %1216 = vmatmul.mubr.f32.vlgmr.msra.gmra.mrb[16].mxu0 %v1568_v60 }
 0x3f2   :  { %1218 = vmatprep.mubr.f32.mxu0 %v1557_v27 }
 0x3f5   :  { %1219 = vmatmul.mubr.f32.gmra.mrb[18].mxu0 %v1563_v58 }
 0x3f6   :  { %1221 = vmatprep.mubr.f32.mxu0 %v598_v32 }
 0x3f9   :  { %1222 = vmatmul.mubr.f32.gmra.mrb[20].mxu0 %v601_v36 }
 0x3fa   :  { %1224 = vmatprep.mubr.f32.mxu0 %v606_v30 }
 0x3fd   :  { %1225 = vmatmul.mubr.f32.gmra.mrb[22].mxu0 %v609_v34 }
 0x3fe   :  { %1227 = vmatprep.mubr.f32.mxu0 %v614_v41 }
 0x401   :  { %1228 = vmatmul.mubr.f32.gmra.mrb[24].mxu0 %v617_v45 }
 0x402   :  { %1230 = vmatprep.mubr.f32.mxu0 %v622_v39 }
 0x405   :  { %1231 = vmatmul.mubr.f32.gmra.mrb[26].mxu0 %v625_v43 }
 0x406   :  { %1233 = vmatprep.mubr.f32.mxu0 %v630_v50 }
 0x409   :  { %1234 = vmatmul.mubr.f32.gmra.mrb[28].mxu0 %v633_v54 }
 0x40a   :  { %1236 = vmatprep.mubr.f32.mxu0 %v638_v48 }
 0x40d   :  { %1237 = vmatmul.mubr.f32.gmra.mrb[30].mxu0 %v641_v52 }
 0x4c4   :  { %v1217_v3 = vpop.f32.mrb[16].mxu0 }
 0x4c5   :  { %v965_v4 = vmul.f32 -1.442695, %v1217_v3  ;;  %v726_v5 = vpop.f32.mrb[17].mxu0 }
 0x4c6   :  { %v964_v6 = vmul.f32 -1.442695, %v726_v5 }
 0x4c7   :  { %1291 = vpow2.f32 %v965_v4 }
 0x4c8   :  { %1293 = vpow2.f32 %v964_v6  ;;  %v1220_v7 = vpop.f32.mrb[18].mxu0 }
 0x4c9   :  { %v967_v8 = vmul.f32 -1.442695, %v1220_v7  ;;  %v736_v9 = vpop.f32.mrb[19].mxu0 }
 0x4ca   :  { %v966_v1 = vmul.f32 -1.442695, %v736_v9 }
 0x4cb   :  { %1295 = vpow2.f32 %v967_v8 }
 0x4cc   :  { %1297 = vpow2.f32 %v966_v1  ;;  %v1223_v10 = vpop.f32.mrb[20].mxu0 }
 0x4cd   :  { %v969_v11 = vmul.f32 -1.442695, %v1223_v10  ;;  %v746_v12 = vpop.f32.mrb[21].mxu0 }
 0x4ce   :  { %v968_v13 = vmul.f32 -1.442695, %v746_v12 }
 0x4cf   :  { %1299 = vpow2.f32 %v969_v11 }
 0x4d0   :  { %1301 = vpow2.f32 %v968_v13  ;;  %v1226_v14 = vpop.f32.mrb[22].mxu0 }
 0x4d1   :  { %v1292_v15 = vpop.eup %1291  ;;  %v971_v16 = vmul.f32 -1.442695, %v1226_v14  ;;  %v756_v17 = vpop.f32.mrb[23].mxu0 }
 0x4d2   :  { %v1294_v18 = vpop.eup %1293  ;;  %v854_v19 = vadd.f32 1.0, %v1292_v15  ;;  %v970_v20 = vmul.f32 -1.442695, %v756_v17 }
 0x4d3   :  { %v853_v21 = vadd.f32 1.0, %v1294_v18  ;;  %1303 = vpow2.f32 %v971_v16 }
 0x4d4   :  { %1305 = vrcp.f32 %v854_v19  ;;  %v1229_v22 = vpop.f32.mrb[24].mxu0 }
 0x4d5   :  { %v1296_v23 = vpop.eup %1295  ;;  %1307 = vrcp.f32 %v853_v21  ;;  %v973_v24 = vmul.f32 -1.442695, %v1229_v22  ;;  %v766_v25 = vpop.f32.mrb[25].mxu0 }
 0x4d6   :  { %v1298_v26 = vpop.eup %1297  ;;  %v856_v27 = vadd.f32 1.0, %v1296_v23  ;;  %1309 = vpow2.f32 %v970_v20  ;;  %v972_v56 = vmul.f32 -1.442695, %v766_v25 }
 0x4d7   :  { %v855_v28 = vadd.f32 1.0, %v1298_v26  ;;  %1311 = vpow2.f32 %v973_v24 }
 0x4d8   :  { %1313 = vrcp.f32 %v856_v27  ;;  %v1232_v57 = vpop.f32.mrb[26].mxu0 }
 0x4d9   :  { %v1300_v58 = vpop.eup %1299  ;;  %1315 = vrcp.f32 %v855_v28  ;;  %v975_v59 = vmul.f32 -1.442695, %v1232_v57  ;;  %v776_v60 = vpop.f32.mrb[27].mxu0 }
 0x4da   :  { %v1302_v61 = vpop.eup %1301  ;;  %v858_v62 = vadd.f32 1.0, %v1300_v58  ;;  %1317 = vpow2.f32 %v972_v56  ;;  %v974_v29 = vmul.f32 -1.442695, %v776_v60 }
 0x4db   :  { %v857_v30 = vadd.f32 1.0, %v1302_v61  ;;  %1319 = vpow2.f32 %v975_v59 }
 0x4dc   :  { %1321 = vrcp.f32 %v858_v62  ;;  %v1235_v31 = vpop.f32.mrb[28].mxu0 }
 0x4dd   :  { %v1304_v32 = vpop.eup %1303  ;;  %1323 = vrcp.f32 %v857_v30  ;;  %v977_v33 = vmul.f32 -1.442695, %v1235_v31  ;;  %v786_v34 = vpop.f32.mrb[29].mxu0 }
 0x4de   :  { %v1306_v35 = vpop.eup %1305  ;;  %v860_v36 = vadd.f32 1.0, %v1304_v32  ;;  %1325 = vpow2.f32 %v974_v29  ;;  %v976_v37 = vmul.f32 -1.442695, %v786_v34 }
 0x4df   :  { %v1308_v38 = vpop.eup %1307  ;;  %902 = vst [vmem:[#allocation2 + $0x8] sm:$0xff] %v1306_v35  ;;  %1327 = vpow2.f32 %v977_v33 }
 0x4e0   :  { %v1310_v39 = vpop.eup %1309  ;;  %901 = vst [vmem:[#allocation2] sm:$0xff] %v1308_v38  ;;  %1329 = vrcp.f32 %v860_v36  ;;  %v1238_v40 = vpop.f32.mrb[30].mxu0 }
 0x4e1   :  { %v1312_v41 = vpop.eup %1311  ;;  %v859_v42 = vadd.f32 1.0, %v1310_v39  ;;  %1331 = vpow2.f32 %v976_v37  ;;  %v979_v43 = vmul.f32 -1.442695, %v1238_v40  ;;  %v796_v44 = vpop.f32.mrb[31].mxu0 }
 0x4e2   :  { %v1314_v45 = vpop.eup %1313  ;;  %v862_v46 = vadd.f32 1.0, %v1312_v41  ;;  %v978_v47 = vmul.f32 -1.442695, %v796_v44 }
 0x4e3   :  { %v1316_v48 = vpop.eup %1315  ;;  %904 = vst [vmem:[#allocation2 + $0x18] sm:$0xff] %v1314_v45  ;;  %1333 = vrcp.f32 %v859_v42 }
 0x4e4   :  { %v1318_v49 = vpop.eup %1317  ;;  %903 = vst [vmem:[#allocation2 + $0x10] sm:$0xff] %v1316_v48  ;;  %1335 = vrcp.f32 %v862_v46 }
 0x4e5   :  { %v1320_v50 = vpop.eup %1319  ;;  %v861_v51 = vadd.f32 1.0, %v1318_v49  ;;  %1337 = vpow2.f32 %v979_v43 }
 0x4e6   :  { %v1322_v52 = vpop.eup %1321  ;;  %v864_v53 = vadd.f32 1.0, %v1320_v50  ;;  %1339 = vpow2.f32 %v978_v47 }
 0x4e7   :  { %v1324_v54 = vpop.eup %1323  ;;  %906 = vst [vmem:[#allocation2 + $0x28] sm:$0xff] %v1322_v52  ;;  %1341 = vrcp.f32 %v861_v51 }
 0x4e8   :  { %v1326_v55 = vpop.eup %1325  ;;  %905 = vst [vmem:[#allocation2 + $0x20] sm:$0xff] %v1324_v54  ;;  %1343 = vrcp.f32 %v864_v53 }
 0x4e9   :  { %v1328_v63 = vpop.eup %1327  ;;  %v863_v0 = vadd.f32 1.0, %v1326_v55 }
 0x4ea   :  { %v1330_v2 = vpop.eup %1329  ;;  %v866_v3 = vadd.f32 1.0, %v1328_v63 }
 0x4eb   :  { %v1332_v4 = vpop.eup %1331  ;;  %908 = vst [vmem:[#allocation2 + $0x38] sm:$0xff] %v1330_v2  ;;  %1345 = vrcp.f32 %v863_v0 }
 0x4ec   :  { %1347 = vrcp.f32 %v866_v3  ;;  %v865_v5 = vadd.f32 1.0, %v1332_v4 }
 0x4ed   :  { %v1334_v6 = vpop.eup %1333 }
 0x4ee   :  { %v1336_v7 = vpop.eup %1335  ;;  %907 = vst [vmem:[#allocation2 + $0x30] sm:$0xff] %v1334_v6  ;;  %1349 = vrcp.f32 %v865_v5 }
 0x4ef   :  { %v1338_v8 = vpop.eup %1337  ;;  %910 = vst [vmem:[#allocation2 + $0x48] sm:$0xff] %v1336_v7 }
 0x4f0   :  { %v1340_v9 = vpop.eup %1339  ;;  %v868_v1 = vadd.f32 1.0, %v1338_v8 }
 0x4f1   :  { %v1342_v10 = vpop.eup %1341  ;;  %v867_v11 = vadd.f32 1.0, %v1340_v9 }
 0x4f2   :  { %v1344_v12 = vpop.eup %1343  ;;  %909 = vst [vmem:[#allocation2 + $0x40] sm:$0xff] %v1342_v10  ;;  %1351 = vrcp.f32 %v868_v1 }
 0x4f3   :  { %912 = vst [vmem:[#allocation2 + $0x58] sm:$0xff] %v1344_v12  ;;  %1353 = vrcp.f32 %v867_v11 }
 0x4f5   :  { %v1346_v13 = vpop.eup %1345 }
 0x4f6   :  { %v1348_v14 = vpop.eup %1347  ;;  %911 = vst [vmem:[#allocation2 + $0x50] sm:$0xff] %v1346_v13 }
 0x4f7   :  { %914 = vst [vmem:[#allocation2 + $0x68] sm:$0xff] %v1348_v14 }
 0x4f8   :  { %v1350_v15 = vpop.eup %1349 }
 0x4f9   :  { %913 = vst [vmem:[#allocation2 + $0x60] sm:$0xff] %v1350_v15 }
 0x4fc   :  { %v1352_v16 = vpop.eup %1351 }
 0x4fd   :  { %v1354_v17 = vpop.eup %1353  ;;  %916 = vst [vmem:[#allocation2 + $0x78] sm:$0xff] %v1352_v16 }
 0x4fe   :  { %915 = vst [vmem:[#allocation2 + $0x70] sm:$0xff] %v1354_v17 }
 0x4ff   :  { %1366 = shalt.err (!%p1363_p4)
}
 0x500   :  { %s1367_s15 = scalar_lea.hbm %s1636_s4, 2048 }
 0x501   :  { %p1368_p5 = scmp.ne.s32.totalorder %s1636_s4, %s1367_s15  ;;  %p1371_p6 = scmp.lt.u32.totalorder %s1367_s15, %s1636_s4 }
 0x503   :  { %p1373_p7 = pnand %p1371_p6, %p1368_p5 }
 0x505   :  { %1376 = shalt.err (!%p1373_p7)
}
 0x506   :  { %s1380_s20 = smov 128   ;;  %s1381_s21 = smov 8  }
 0x507   :  { %928 = dma.vmem_to_hbm [thread:$0]  %s923_s12, 2048, %s1636_s4, [#allocation3], %s1380_s20, %s1380_s20, %s1381_s21  }
 0x508   :  { %1377 = dma.done.wait [#allocation3], 2048  }
 0x509   :  { %1378 = vsyncadd [#allocation3], 4294965248 }
 0x50a   :  { %936 = vsyncpa [#allocation3], 1 }

</bundles_post_ra>
